<compile_context>
chip_gen: v7x
topology: tpu7x:2x2x1
jax: 0.10.0
libtpu: 0.0.40
codegen_flags: <defaults>
</compile_context>

<pallas_src>
import jax
import jax.numpy as jnp
from jax.experimental import pallas as pl
from jax.experimental.pallas import tpu as pltpu


# ---------------------------------------------------------------------------
# Kernel: fused FRN over a band of (batch*channel) rows.
# ---------------------------------------------------------------------------
def frn_kernel(x_ref, gamma_ref, beta_ref, eps_ref, o_ref):
    # x_ref     : (BR, HW)  rows = flattened (b, c) pairs, lanes = flattened H*W
    # gamma_ref : (BR, 1)   per-row gamma (pre-broadcast from (1,C,1,1))
    # beta_ref  : (BR, 1)   per-row beta
    # eps_ref   : (1, 1)    scalar eps (abs taken in-kernel, as in the module)
    # o_ref     : (BR, HW)
    x = x_ref[...].astype(jnp.float32)

    # nu2 = mean(x^2) over H,W  -> row reduction along the lane axis.
    nu2 = jnp.mean(x * x, axis=1, keepdims=True)                 # (BR, 1)

    # x * rsqrt(nu2 + |eps|)  (rsqrt lowers to the EUP; broadcast along lanes)
    inv = jax.lax.rsqrt(nu2 + jnp.abs(eps_ref[...]))             # (BR, 1)
    y = x * inv                                                  # (BR, HW)

    # TLU-less affine (forward() has no max(., tau)): gamma * y + beta
    o_ref[...] = (gamma_ref[...] * y + beta_ref[...]).astype(o_ref.dtype)


# ---------------------------------------------------------------------------
# Wrapper: NCHW in / NCHW out (PyTorch convention).
# ---------------------------------------------------------------------------
def frn_forward(x_nchw, gamma, beta, eps):
    B, C, H, W = x_nchw.shape
    BC, HW = B * C, H * W

    # (B,C,H,W) -> (B*C, H*W): contiguous reshape, lane axis = H*W (lane-dense).
    x2d = x_nchw.reshape(BC, HW).astype(jnp.float32)

    # gamma/beta: (1,C,1,1) -> one scalar per (b,c) row.
    g2d = jnp.broadcast_to(gamma.reshape(1, C), (B, C)).reshape(BC, 1)
    b2d = jnp.broadcast_to(beta.reshape(1, C), (B, C)).reshape(BC, 1)
    eps2d = jnp.asarray(eps, jnp.float32).reshape(1, 1)

    # Row-band tile: sublane-aligned (multiple of 8) when possible.
    if BC <= 8:
        BR = BC
    else:
        BR = min(64, (BC // 8) * 8)
    grid = (pl.cdiv(BC, BR),)

    out2d = pl.pallas_call(
        frn_kernel,
        out_shape=jax.ShapeDtypeStruct((BC, HW), jnp.float32),
        grid=grid,
        in_specs=[
            pl.BlockSpec((BR, HW), lambda i: (i, 0)),
            pl.BlockSpec((BR, 1), lambda i: (i, 0)),
            pl.BlockSpec((BR, 1), lambda i: (i, 0)),
            pl.BlockSpec((1, 1), lambda i: (0, 0)),
        ],
        out_specs=pl.BlockSpec((BR, HW), lambda i: (i, 0)),
        compiler_params=pltpu.CompilerParams(
            dimension_semantics=("parallel",)),
    )(x2d, g2d, b2d, eps2d)

    return out2d.reshape(B, C, H, W)


# ---------------------------------------------------------------------------
# Pure-JAX reference (direct transcription of FRN.forward)
# ---------------------------------------------------------------------------
def frn_reference(x_nchw, gamma, beta, eps):
    nu2 = jnp.mean(jnp.square(x_nchw), axis=(2, 3), keepdims=True)
    xn = x_nchw * jax.lax.rsqrt(nu2 + jnp.abs(jnp.asarray(eps, jnp.float32)))
    return gamma * xn + beta


if __name__ == "__main__":
    key = jax.random.PRNGKey(0)
    kx, kg, kb = jax.random.split(key, 3)

    B, C, H, W = 2, 4, 16, 16
    x = jax.random.normal(kx, (B, C, H, W), jnp.float32)          # NCHW

    # Module defaults are gamma=1, beta=0, eps=1e-6; use random gamma/beta so
    # the affine path is actually exercised.
    gamma = (1.0 + 0.1 * jax.random.normal(kg, (C,), jnp.float32)).reshape(1, C, 1, 1)
    beta = (0.1 * jax.random.normal(kb, (C,), jnp.float32)).reshape(1, C, 1, 1)
    eps = 1e-6

    out = frn_forward(x, gamma, beta, eps)
    out = jax.block_until_ready(out)

    ref = frn_reference(x, gamma, beta, eps)
    assert out.shape == (B, C, H, W)
    assert jnp.allclose(out, ref, atol=1e-4, rtol=1e-4), \
        f"max err {jnp.max(jnp.abs(out - ref))}"
    print("KERNEL_OK")
</pallas_src>

<mosaic_0001>
module attributes {stable_mosaic.version = 11 : i64} {
  func.func @frn_kernel(%arg0: i32, %arg1: memref<8x256xf32, #tpu.memory_space<vmem>>, %arg2: memref<8x1xf32, #tpu.memory_space<vmem>>, %arg3: memref<8x1xf32, #tpu.memory_space<vmem>>, %arg4: memref<1x1xf32, #tpu.memory_space<vmem>>, %arg5: memref<8x256xf32, #tpu.memory_space<vmem>>) attributes {dimension_semantics = [#tpu.dimension_semantics<parallel>], iteration_bounds = array<i64: 1>, scalar_prefetch = 0 : i64, scratch_operands = 0 : i64, tpu.core_type = #tpu.core_type<tc>, window_params = [{transform_indices = @transform_0, window_bounds = array<i64: 8, 256>}, {transform_indices = @transform_1, window_bounds = array<i64: 8, 1>}, {transform_indices = @transform_2, window_bounds = array<i64: 8, 1>}, {pipeline_mode = #tpu.pipeline_mode<synchronous>, transform_indices = @transform_3, window_bounds = array<i64: 1, 1>}, {transform_indices = @transform_4, window_bounds = array<i64: 8, 256>}]} {
    %c0 = arith.constant 0 : index
    %c0_0 = arith.constant 0 : index
    %0 = vector.load %arg1[%c0, %c0_0] : memref<8x256xf32, #tpu.memory_space<vmem>>, vector<8x256xf32>
    %1 = arith.mulf %0, %0 : vector<8x256xf32>
    %cst = arith.constant dense<0.000000e+00> : vector<8xf32>
    %2 = vector.multi_reduction <add>, %1, %cst [1] : vector<8x256xf32> to vector<8xf32>
    %3 = vector.shape_cast %2 : vector<8xf32> to vector<8x1xf32>
    %cst_1 = arith.constant 2.560000e+02 : f32
    %4 = vector.broadcast %cst_1 : f32 to vector<8x1xf32>
    %5 = arith.divf %3, %4 : vector<8x1xf32>
    %c0_2 = arith.constant 0 : index
    %c0_3 = arith.constant 0 : index
    %6 = vector.load %arg4[%c0_2, %c0_3] : memref<1x1xf32, #tpu.memory_space<vmem>>, vector<1x1xf32>
    %7 = math.absf %6 : vector<1x1xf32>
    %8 = vector.broadcast %7 : vector<1x1xf32> to vector<8x1xf32>
    %9 = arith.addf %5, %8 : vector<8x1xf32>
    %10 = math.rsqrt %9 : vector<8x1xf32>
    %11 = vector.broadcast %10 : vector<8x1xf32> to vector<8x256xf32>
    %12 = arith.mulf %0, %11 : vector<8x256xf32>
    %c0_4 = arith.constant 0 : index
    %c0_5 = arith.constant 0 : index
    %13 = vector.load %arg2[%c0_4, %c0_5] : memref<8x1xf32, #tpu.memory_space<vmem>>, vector<8x1xf32>
    %14 = vector.broadcast %13 : vector<8x1xf32> to vector<8x256xf32>
    %15 = arith.mulf %14, %12 : vector<8x256xf32>
    %c0_6 = arith.constant 0 : index
    %c0_7 = arith.constant 0 : index
    %16 = vector.load %arg3[%c0_6, %c0_7] : memref<8x1xf32, #tpu.memory_space<vmem>>, vector<8x1xf32>
    %17 = vector.broadcast %16 : vector<8x1xf32> to vector<8x256xf32>
    %18 = arith.addf %15, %17 : vector<8x256xf32>
    %c0_8 = arith.constant 0 : index
    %c0_9 = arith.constant 0 : index
    %19 = vector.load %arg5[%c0_8, %c0_9] : memref<8x256xf32, #tpu.memory_space<vmem>>, vector<8x256xf32>
    tpu.vector_store %arg5[%c0_8, %c0_9], %18 {strides = array<i32>} : memref<8x256xf32, #tpu.memory_space<vmem>>, vector<8x256xf32>,
    return
  }
  func.func @transform_0(%arg0: i32) -> (i32, i32) {
    %c0_i32 = arith.constant 0 : i32
    %c0_i32_0 = arith.constant 0 : i32
    return %arg0, %c0_i32 : i32, i32
  }
  func.func @transform_1(%arg0: i32) -> (i32, i32) {
    %c0_i32 = arith.constant 0 : i32
    %c0_i32_0 = arith.constant 0 : i32
    return %arg0, %c0_i32 : i32, i32
  }
  func.func @transform_2(%arg0: i32) -> (i32, i32) {
    %c0_i32 = arith.constant 0 : i32
    %c0_i32_0 = arith.constant 0 : i32
    return %arg0, %c0_i32 : i32, i32
  }
  func.func @transform_3(%arg0: i32) -> (i32, i32) {
    %c0_i32 = arith.constant 0 : i32
    %c0_i32_0 = arith.constant 0 : i32
    %c0_i32_1 = arith.constant 0 : i32
    return %c0_i32, %c0_i32_0 : i32, i32
  }
  func.func @transform_4(%arg0: i32) -> (i32, i32) {
    %c0_i32 = arith.constant 0 : i32
    %c0_i32_0 = arith.constant 0 : i32
    return %arg0, %c0_i32 : i32, i32
  }
}

</mosaic_0001>

<bundles_post_ra>
// kernel: tpu_custom_call.1
= control target key start
LH: loop header
LB: loop body
LE: loop exit
PB: predicated region body
PF: predicated region fallthrough
CT: control target
= control target key end

     0   :  { %s162_s0 = inlined_call_operand.vmem [shape: f32[8,256], index: 0, kind: input, shape index: {}]   ;;  %s163_s1 = inlined_call_operand.vmem [shape: f32[8,1], index: 1, kind: input, shape index: {}]   ;;  %s164_s2 = inlined_call_operand.vmem [shape: f32[8,1], index: 2, kind: input, shape index: {}]   ;;  %s165_s3 = inlined_call_operand.<no memory space> [shape: f32[1,1], index: 3, kind: input, shape index: {}]   ;;  %s166_s4 = inlined_call_operand.hbm [shape: f32[8,256], index: 4, kind: output, shape index: {}]  }
   0x1   :  { %v9_v0 = vstv %s165_s3 }
   0x2   :  { %10 = vst [vmem:[#allocation2] sm:$0x1] %v9_v0 }
   0x3   :  { %v20_v1 = vld [vmem:[%s162_s0] sm:$0xff]  ;;  %v21_v2 = vld [vmem:[%s162_s0 + $0x8] sm:$0xff] }
   0x4   :  { %v22_v3 = vmul.f32 %v20_v1, %v20_v1  ;;  %v23_v4 = vmul.f32 %v21_v2, %v21_v2 }
   0x5   :  { %11 = vsyncpa [#allocation4], 0  ;;  %v46_v6 = vld [vmem:[%s163_s1] sm:$0xff]  ;;  %v108_v7 = vmov 0   ;;  %v32_v9 = vlaneseq  ;;  %s109_s0 = smov [#allocation3]  }
   0x6   :  { %v24_v5 = vadd.f32 %v23_v4, %v22_v3  ;;  %81 = vset.pattern.permute.xlu1 %v108_v7  ;;  %80 = vset.pattern.permute.xlu0 %v108_v7  ;;  %v54_v8 = vld [vmem:[%s164_s2] sm:$0xff]  ;;  %s70_s1 = sshll.u32 %s109_s0, 4  ;;  %s71_s1 = int_to_ptr.vmem [resolvable:$true] %s70_s1 }
   0x7   :  { %49 = vperm.xlu1 %81, %v46_v6   ;;  %v33_v10 = vshrl.u32 %v32_v9, 7  ;;  %s84_s2 = scalar_lea.vmem %s71_s1, 256  ;;  %p89_p1 = scmp.lt.s32.totalorder %s71_s1, %s71_s1 }
   0x8   :  { %25 = vadd.xlane.f32.xlu0 %v24_v5  ;;  %p85_p0 = scmp.ne.s32.totalorder %s71_s1, %s84_s2  ;;  %p90_p2 = scmp.lt.s32.totalorder %s84_s2, %s84_s2 }
   0x9   :  { %v29_v11 = vld [vmem:[#allocation2] sm:$0x1]  ;;  %v34_v13 = vsub.s32 0, %v33_v10 }
   0xa   :  { %v30_v12 = vand.u32 2147483647, %v29_v11  ;;  %p91_p3 = por %p90_p2, %p89_p1 }
   0xb   :  { %57 = vperm.xlu1 %81, %v54_v8  }
   0xc   :  { %v35_v14 = vrot.slane %v30_v12, %v34_v13  ;;  %p92_p4 = pnand %p91_p3, %p85_p0 }
  0x86   :  { %v50_v19 = vpop.permute.xlu1 %49 }
  0x8a   :  { %v58_v25 = vpop.permute.xlu1 %57 }
  0x95   :  { %v26_v15 = vpop.xlane.xlu0 %25 }
  0x96   :  { %v28_v16 = vmul.f32 0.00390625, %v26_v15 }
  0x98   :  { %v37_v17 = vadd.f32 %v35_v14, %v28_v16 }
  0x9a   :  { %82 = vrsqrt.f32 %v37_v17 }
  0xa4   :  { %v83_v18 = vpop.eup %82 }
  0xa5   :  { %41 = vperm.xlu0 %80, %v83_v18  }
 0x124   :  { %v42_v20 = vpop.permute.xlu0 %41 }
 0x125   :  { %v44_v21 = vmul.f32 %v42_v20, %v20_v1  ;;  %v45_v22 = vmul.f32 %v42_v20, %v21_v2 }
 0x127   :  { %v52_v23 = vmul.f32 %v50_v19, %v44_v21  ;;  %v53_v24 = vmul.f32 %v50_v19, %v45_v22 }
 0x129   :  { %v60_v26 = vadd.f32 %v58_v25, %v52_v23  ;;  %v61_v27 = vadd.f32 %v58_v25, %v53_v24 }
 0x12b   :  { %62 = vst [vmem:[#allocation3] sm:$0xff] %v60_v26  ;;  %63 = vst [vmem:[#allocation3 + $0x8] sm:$0xff] %v61_v27 }
 0x12c   :  { %95 = shalt.err (!%p92_p4)
}
 0x12d   :  { %s96_s26 = scalar_lea.hbm %s166_s4, 256 }
 0x12e   :  { %p97_p5 = scmp.ne.s32.totalorder %s166_s4, %s96_s26  ;;  %p100_p6 = scmp.lt.u32.totalorder %s96_s26, %s166_s4 }
 0x130   :  { %p102_p7 = pnand %p100_p6, %p97_p5 }
 0x132   :  { %105 = shalt.err (!%p102_p7)
}
 0x133   :  { %73 = dma.vmem_to_hbm [thread:$0]  %s71_s1, 256, %s166_s4, [#allocation4]  }
 0x134   :  { %106 = dma.done.wait [#allocation4], 256  }
 0x135   :  { %107 = vsyncadd [#allocation4], 4294967040 }
 0x136   :  { %77 = vsyncpa [#allocation4], 1 }

</bundles_post_ra>
